<compile_context>
chip_gen: v7x
topology: tpu7x:2x2x1
jax: 0.10.0
libtpu: 0.0.40
codegen_flags: <defaults>
</compile_context>

<pallas_src>
import jax
import jax.numpy as jnp
from jax.experimental import pallas as pl
from jax.experimental.pallas import tpu as pltpu

D_IN, D_HID, D_OUT = 32, 16, 4


def _multinet_kernel(xt_ref, w1_ref, b1_ref, wh_ref, bh_ref, noise_ref, out_ref):
    # xt_ref: (32, TB)   lane-dense batch tile
    xt = xt_ref[...]
    # hidden layer + ReLU: (16, 32) @ (32, TB) -> (16, TB)
    h = jnp.dot(w1_ref[...], xt, preferred_element_type=jnp.float32) + b1_ref[...]
    h = jnp.maximum(h, 0.0)
    # fused mu|sigma head: (8, 16) @ (16, TB) -> (8, TB)
    y = jnp.dot(wh_ref[...], h, preferred_element_type=jnp.float32) + bh_ref[...]
    mu = y[:D_OUT, :]        # (4, TB)
    sigma = y[D_OUT:, :]     # (4, TB)
    # reparameterized output, lane-dense
    out_ref[...] = noise_ref[...] * sigma + mu


def multinet_forward(x, params, noise, *, block_b=4096):
    """x: (B, 32) f32, noise: (B, 4) f32 -> (B, 4) f32.

    params are in PyTorch Linear layout: W (out, in), b (out,).
    """
    B = x.shape[0]
    w1, b1, wmu, bmu, wsig, bsig = params

    # Fuse the two heads once, outside the kernel.
    wh = jnp.concatenate([wmu, wsig], axis=0)              # (8, 16)
    bh = jnp.concatenate([bmu, bsig], axis=0)[:, None]     # (8, 1)
    b1c = b1[:, None]                                      # (16, 1)

    # Lane-dense layout: put the batch on the last (lane) dimension.
    xt = x.T                                               # (32, B)
    nt = noise.T                                           # (4, B)

    # Batch tile: largest multiple of 128 up to block_b; pad B to a multiple.
    TB = min(block_b, max(128, ((B + 127) // 128) * 128))
    Bp = pl.cdiv(B, TB) * TB
    if Bp != B:
        xt = jnp.pad(xt, ((0, 0), (0, Bp - B)))
        nt = jnp.pad(nt, ((0, 0), (0, Bp - B)))

    batch_spec = lambda rows: pl.BlockSpec((rows, TB), lambda i: (0, i))
    const_spec = lambda shape: pl.BlockSpec(shape, lambda i: (0, 0))

    out_t = pl.pallas_call(
        _multinet_kernel,
        out_shape=jax.ShapeDtypeStruct((D_OUT, Bp), jnp.float32),
        grid=(Bp // TB,),
        in_specs=[
            batch_spec(D_IN),                 # x^T tile        (32, TB)
            const_spec((D_HID, D_IN)),        # W1              (16, 32)
            const_spec((D_HID, 1)),           # b1              (16, 1)
            const_spec((2 * D_OUT, D_HID)),   # [Wmu; Wsig]     (8, 16)
            const_spec((2 * D_OUT, 1)),       # [bmu; bsig]     (8, 1)
            batch_spec(D_OUT),                # noise^T tile    (4, TB)
        ],
        out_specs=batch_spec(D_OUT),          # out^T tile      (4, TB)
        compiler_params=pltpu.CompilerParams(
            dimension_semantics=("parallel",),
            vmem_limit_bytes=32 * 1024 * 1024,
        ),
    )(xt, w1, b1c, wh, bh, nt)

    # Un-pad and return features-last like the PyTorch module.
    return out_t[:, :B].T


def init_params(key):
    """Deterministic synthetic parameters in PyTorch Linear layout."""
    k1, k2, k3, k4, k5, k6 = jax.random.split(key, 6)
    w1 = jax.random.normal(k1, (D_HID, D_IN), jnp.float32) * 0.1
    b1 = jax.random.normal(k2, (D_HID,), jnp.float32) * 0.1
    wmu = jax.random.normal(k3, (D_OUT, D_HID), jnp.float32) * 0.1
    bmu = jax.random.normal(k4, (D_OUT,), jnp.float32) * 0.1
    wsig = jax.random.normal(k5, (D_OUT, D_HID), jnp.float32) * 0.1
    bsig = jax.random.normal(k6, (D_OUT,), jnp.float32) * 0.1
    return (w1, b1, wmu, bmu, wsig, bsig)


def reference_forward(x, params, noise):
    w1, b1, wmu, bmu, wsig, bsig = params
    h = jnp.maximum(x @ w1.T + b1, 0.0)
    mu = h @ wmu.T + bmu
    sigma = h @ wsig.T + bsig
    return noise * sigma + mu


if __name__ == "__main__":
    key = jax.random.PRNGKey(0)
    k_x, k_p, k_n, k_x2, k_n2 = jax.random.split(key, 5)

    params = init_params(k_p)

    # Small demo batch (pads to one 128-wide lane tile).
    B = 8
    x = jax.random.normal(k_x, (B, D_IN), jnp.float32)
    noise = jax.random.normal(k_n, (B, D_OUT), jnp.float32)   # Normal(0, 1) sample
    out = jax.block_until_ready(multinet_forward(x, params, noise))
    ref = reference_forward(x, params, noise)
    assert out.shape == (B, D_OUT)
    assert jnp.allclose(out, ref, atol=1e-5, rtol=1e-4), "mismatch vs reference (B=8)"

    # Exercise multi-tile grid + padding path (B not divisible by the tile).
    B2 = 300
    x2 = jax.random.normal(k_x2, (B2, D_IN), jnp.float32)
    noise2 = jax.random.normal(k_n2, (B2, D_OUT), jnp.float32)
    out2 = jax.block_until_ready(multinet_forward(x2, params, noise2, block_b=128))
    ref2 = reference_forward(x2, params, noise2)
    assert out2.shape == (B2, D_OUT)
    assert jnp.allclose(out2, ref2, atol=1e-5, rtol=1e-4), "mismatch vs reference (B=300)"

    print("KERNEL_OK")
</pallas_src>

<mosaic_0001>
module attributes {stable_mosaic.version = 11 : i64} {
  func.func @_multinet_kernel(%arg0: i32, %arg1: memref<32x128xf32, #tpu.memory_space<vmem>>, %arg2: memref<16x32xf32, #tpu.memory_space<vmem>>, %arg3: memref<16x1xf32, #tpu.memory_space<vmem>>, %arg4: memref<8x16xf32, #tpu.memory_space<vmem>>, %arg5: memref<8x1xf32, #tpu.memory_space<vmem>>, %arg6: memref<4x128xf32, #tpu.memory_space<vmem>>, %arg7: memref<4x128xf32, #tpu.memory_space<vmem>>) attributes {dimension_semantics = [#tpu.dimension_semantics<parallel>], iteration_bounds = array<i64: 1>, scalar_prefetch = 0 : i64, scratch_operands = 0 : i64, tpu.core_type = #tpu.core_type<tc>, window_params = [{transform_indices = @transform_0, window_bounds = array<i64: 32, 128>}, {pipeline_mode = #tpu.pipeline_mode<synchronous>, transform_indices = @transform_1, window_bounds = array<i64: 16, 32>}, {pipeline_mode = #tpu.pipeline_mode<synchronous>, transform_indices = @transform_2, window_bounds = array<i64: 16, 1>}, {pipeline_mode = #tpu.pipeline_mode<synchronous>, transform_indices = @transform_3, window_bounds = array<i64: 8, 16>}, {pipeline_mode = #tpu.pipeline_mode<synchronous>, transform_indices = @transform_4, window_bounds = array<i64: 8, 1>}, {transform_indices = @transform_5, window_bounds = array<i64: 4, 128>}, {transform_indices = @transform_6, window_bounds = array<i64: 4, 128>}]} {
    %c0 = arith.constant 0 : index
    %c0_0 = arith.constant 0 : index
    %0 = vector.load %arg1[%c0, %c0_0] : memref<32x128xf32, #tpu.memory_space<vmem>>, vector<32x128xf32>
    %c0_1 = arith.constant 0 : index
    %c0_2 = arith.constant 0 : index
    %1 = vector.load %arg2[%c0_1, %c0_2] : memref<16x32xf32, #tpu.memory_space<vmem>>, vector<16x32xf32>
    %cst = arith.constant dense<0.000000e+00> : vector<16x128xf32>
    %2 = tpu.matmul %1, %0, %cst {dimension_numbers = #tpu.dot_dimension_numbers<[1], [0], [0], [1], [0, 0, 1, 1], [], []>} : vector<16x32xf32>, vector<32x128xf32>, vector<16x128xf32> -> vector<16x128xf32>
    %c0_3 = arith.constant 0 : index
    %c0_4 = arith.constant 0 : index
    %3 = vector.load %arg3[%c0_3, %c0_4] : memref<16x1xf32, #tpu.memory_space<vmem>>, vector<16x1xf32>
    %4 = vector.broadcast %3 : vector<16x1xf32> to vector<16x128xf32>
    %5 = arith.addf %2, %4 : vector<16x128xf32>
    %cst_5 = arith.constant 0.000000e+00 : f32
    %6 = vector.broadcast %cst_5 : f32 to vector<16x128xf32>
    %7 = arith.maximumf %5, %6 : vector<16x128xf32>
    %c0_6 = arith.constant 0 : index
    %c0_7 = arith.constant 0 : index
    %8 = vector.load %arg4[%c0_6, %c0_7] : memref<8x16xf32, #tpu.memory_space<vmem>>, vector<8x16xf32>
    %cst_8 = arith.constant dense<0.000000e+00> : vector<8x128xf32>
    %9 = tpu.matmul %8, %7, %cst_8 {dimension_numbers = #tpu.dot_dimension_numbers<[1], [0], [0], [1], [0, 0, 1, 1], [], []>} : vector<8x16xf32>, vector<16x128xf32>, vector<8x128xf32> -> vector<8x128xf32>
    %c0_9 = arith.constant 0 : index
    %c0_10 = arith.constant 0 : index
    %10 = vector.load %arg5[%c0_9, %c0_10] : memref<8x1xf32, #tpu.memory_space<vmem>>, vector<8x1xf32>
    %11 = vector.broadcast %10 : vector<8x1xf32> to vector<8x128xf32>
    %12 = arith.addf %9, %11 : vector<8x128xf32>
    %13 = vector.extract_strided_slice %12 {offsets = [0, 0], sizes = [4, 128], strides = [1, 1]} : vector<8x128xf32> to vector<4x128xf32>
    %14 = vector.extract_strided_slice %12 {offsets = [4, 0], sizes = [4, 128], strides = [1, 1]} : vector<8x128xf32> to vector<4x128xf32>
    %c0_11 = arith.constant 0 : index
    %c0_12 = arith.constant 0 : index
    %15 = vector.load %arg6[%c0_11, %c0_12] : memref<4x128xf32, #tpu.memory_space<vmem>>, vector<4x128xf32>
    %16 = arith.mulf %15, %14 : vector<4x128xf32>
    %17 = arith.addf %16, %13 : vector<4x128xf32>
    %c0_13 = arith.constant 0 : index
    %c0_14 = arith.constant 0 : index
    %18 = vector.load %arg7[%c0_13, %c0_14] : memref<4x128xf32, #tpu.memory_space<vmem>>, vector<4x128xf32>
    tpu.vector_store %arg7[%c0_13, %c0_14], %17 {strides = array<i32>} : memref<4x128xf32, #tpu.memory_space<vmem>>, vector<4x128xf32>,
    return
  }
  func.func @transform_0(%arg0: i32) -> (i32, i32) {
    %c0_i32 = arith.constant 0 : i32
    %c0_i32_0 = arith.constant 0 : i32
    return %c0_i32, %arg0 : i32, i32
  }
  func.func @transform_1(%arg0: i32) -> (i32, i32) {
    %c0_i32 = arith.constant 0 : i32
    %c0_i32_0 = arith.constant 0 : i32
    %c0_i32_1 = arith.constant 0 : i32
    return %c0_i32, %c0_i32_0 : i32, i32
  }
  func.func @transform_2(%arg0: i32) -> (i32, i32) {
    %c0_i32 = arith.constant 0 : i32
    %c0_i32_0 = arith.constant 0 : i32
    %c0_i32_1 = arith.constant 0 : i32
    return %c0_i32, %c0_i32_0 : i32, i32
  }
  func.func @transform_3(%arg0: i32) -> (i32, i32) {
    %c0_i32 = arith.constant 0 : i32
    %c0_i32_0 = arith.constant 0 : i32
    %c0_i32_1 = arith.constant 0 : i32
    return %c0_i32, %c0_i32_0 : i32, i32
  }
  func.func @transform_4(%arg0: i32) -> (i32, i32) {
    %c0_i32 = arith.constant 0 : i32
    %c0_i32_0 = arith.constant 0 : i32
    %c0_i32_1 = arith.constant 0 : i32
    return %c0_i32, %c0_i32_0 : i32, i32
  }
  func.func @transform_5(%arg0: i32) -> (i32, i32) {
    %c0_i32 = arith.constant 0 : i32
    %c0_i32_0 = arith.constant 0 : i32
    return %c0_i32, %arg0 : i32, i32
  }
  func.func @transform_6(%arg0: i32) -> (i32, i32) {
    %c0_i32 = arith.constant 0 : i32
    %c0_i32_0 = arith.constant 0 : i32
    return %c0_i32, %arg0 : i32, i32
  }
}

</mosaic_0001>

<bundles_post_ra>
// kernel: tpu_custom_call.1
= control target key start
LH: loop header
LB: loop body
LE: loop exit
PB: predicated region body
PF: predicated region fallthrough
CT: control target
= control target key end

     0   :  { %11 = vsyncpa [#allocation3], 0  ;;  %s432_s0 = inlined_call_operand.hbm [shape: f32[32,128], index: 0, kind: input, shape index: {}]   ;;  %s433_s1 = inlined_call_operand.vmem [shape: f32[16,32], index: 1, kind: input, shape index: {}]   ;;  %s434_s2 = inlined_call_operand.vmem [shape: f32[16,1], index: 2, kind: input, shape index: {}]   ;;  %s435_s3 = inlined_call_operand.vmem [shape: f32[8,16], index: 3, kind: input, shape index: {}]   ;;  %s436_s4 = inlined_call_operand.vmem [shape: f32[8,1], index: 4, kind: input, shape index: {}]   ;;  %s437_s5 = inlined_call_operand.vmem [shape: f32[4,128], index: 5, kind: input, shape index: {}]   ;;  %s438_s6 = inlined_call_operand.hbm [shape: f32[4,128], index: 6, kind: output, shape index: {}]  }
   0x1   :  { %12 = vsyncpa [#allocation4], 0  ;;  %s342_s21 = smov [#allocation2]   ;;  %s294_s25 = scalar_lea.hbm %s432_s0, 512 }
   0x2   :  { %s18_s22 = sshll.u32 %s342_s21, 4  ;;  %p295_p0 = scmp.ne.s32.totalorder %s432_s0, %s294_s25  ;;  %s19_s22 = int_to_ptr.vmem [resolvable:$true] %s18_s22 }
   0x3   :  { %p298_p1 = scmp.lt.u32.totalorder %s294_s25, %s432_s0 }
   0x5   :  { %p300_p2 = pnand %p298_p1, %p295_p0 }
   0x7   :  { %303 = shalt.err (!%p300_p2)
}
   0x8   :  { %s304_s30 = scalar_lea.vmem %s19_s22, 512  ;;  %p309_p4 = scmp.lt.s32.totalorder %s19_s22, %s19_s22 }
   0x9   :  { %p305_p3 = scmp.ne.s32.totalorder %s19_s22, %s304_s30  ;;  %p310_p5 = scmp.lt.s32.totalorder %s304_s30, %s304_s30 }
   0xb   :  { %p311_p6 = por %p310_p5, %p309_p4 }
   0xd   :  { %p312_p7 = pnand %p311_p6, %p305_p3 }
   0xf   :  { %315 = shalt.err (!%p312_p7)
}
  0x10   :  { %s343_s7 = smov 128   ;;  %s344_s8 = smov 8  }
  0x11   :  { %24 = dma.hbm_to_vmem [thread:$0]  %s432_s0, 512, %s19_s22, [#allocation3], %s343_s7, %s343_s7, %s344_s8  }
  0x12   :  { %338 = dma.done.wait [#allocation3], 512  }
  0x13   :  { %339 = vsyncadd [#allocation3], 4294966784  ;;  %v345_v0 = vmov 0   ;;  %vm56_vm0 = vcmask 261120   ;;  %v38_v1 = vld [vmem:[#allocation2] sm:$0xff]  ;;  %v39_v2 = vld [vmem:[#allocation2 + $0x8] sm:$0xff] }
  0x14   :  { %292 = vset.pattern.permute.xlu0 %v345_v0  ;;  %293 = vset.pattern.permute.xlu1 %v345_v0  ;;  %v40_v3 = vld [vmem:[#allocation2 + $0x10] sm:$0xff]  ;;  %v273_v4 = vpack.c.bf16 %v39_v2, %v38_v1  ;;  %v41_v5 = vld [vmem:[#allocation2 + $0x18] sm:$0xff]  ;;  %v42_v6 = vld [vmem:[%s433_s1] sm:$0xff]  ;;  %v346_v11 = vmov 0.0|0.0   ;;  %vm347_vm1 = vmmov 0   ;;  %v348_v12 = vmov 0.0  }
  0x15   :  { %v277_v7 = vpack.c.bf16 %v41_v5, %v40_v3  ;;  %263 = vmatprep.mubr.msk.f32.mxu0 %vm56_vm0, %v42_v6  ;;  %v44_v8 = vld [vmem:[%s434_s2] sm:$0xff]  ;;  %v45_v9 = vld [vmem:[%s434_s2 + $0x8] sm:$0xff]  ;;  %281 = vmatprep.subr.bf16.mxu1 %v346_v11  ;;  %vm147_vm2 = vcmask 130048   ;;  %s349_s21 = smov [#allocation5]  }
  0x16   :  { %274 = vmatprep.subr.bf16.mxu0 %v273_v4  ;;  %48 = vperm.xlu0 %292, %v44_v8   ;;  %v43_v10 = vld [vmem:[%s433_s1 + $0x8] sm:$0xff]  ;;  %v141_v13 = vld [vmem:[%s436_s4] sm:$0xff]  ;;  %s234_s22 = sshll.u32 %s349_s21, 4  ;;  %s235_s22 = int_to_ptr.vmem [resolvable:$true] %s234_s22 }
  0x17   :  { %276 = vmatpush3.bf16.msra.mxu0 %v273_v4  ;;  %270 = vmatprep.mubr.msk.f32.mxu1 %vm347_vm1, %v348_v12  ;;  %v140_v23 = vld [vmem:[%s435_s3] sm:$0xff]  ;;  %s316_s23 = scalar_lea.vmem %s235_s22, 64  ;;  %p321_p9 = scmp.lt.s32.totalorder %s235_s22, %s235_s22 }
  0x18   :  { %278 = vmatprep.subr.bf16.mxu0 %v277_v7  ;;  %144 = vperm.xlu1 %293, %v141_v13   ;;  %v221_v28 = vld [vmem:[%s437_s5] sm:$0xf]  ;;  %p317_p8 = scmp.ne.s32.totalorder %s235_s22, %s316_s23  ;;  %p322_p10 = scmp.lt.s32.totalorder %s316_s23, %s316_s23 }
  0x1a   :  { %53 = vperm.xlu0 %292, %v45_v9   ;;  %p323_p11 = por %p322_p10, %p321_p9 }
  0x1b   :  { %280 = vmatpush3.bf16.msra.mxu0 %v277_v7 }
  0x1c   :  { %p324_p12 = pnand %p323_p11, %p317_p8 }
  0x1e   :  { %264 = vmatmul.mubr.msk.f32.vlgmr.msra.gmra.mrb[0].mxu0 %vm56_vm0, %v43_v10 }
  0x95   :  { %v49_v14 = vpop.permute.xlu0 %48 }
  0x97   :  { %v145_v24 = vpop.permute.xlu1 %144 }
  0x99   :  { %v54_v15 = vpop.permute.xlu0 %53 }
  0xf1   :  { %v265_v16 = vpop.f32.mrb[0].mxu0 }
  0xf2   :  { %v135_v17 = vadd.f32 %v265_v16, %v54_v15  ;;  %v129_v18 = vpop.f32.mrb[1].mxu0 }
  0xf3   :  { %v130_v19 = vadd.f32 %v129_v18, %v49_v14 }
  0xf4   :  { %v139_v20 = vmax.f32 %v135_v17, 0.0 }
  0xf5   :  { %v138_v21 = vmax.f32 %v130_v19, 0.0 }
  0xf7   :  { %v282_v22 = vpack.c.bf16 %v139_v20, %v138_v21 }
  0xf9   :  { %283 = vmatpush3.bf16.msra.mxu1 %v282_v22 }
  0xfc   :  { %271 = vmatmul.mubr.msk.f32.vlgmr.msra.gmra.mrb[0].mxu1 %vm147_vm2, %v140_v23 }
 0x1cf   :  { %v217_v25 = vpop.f32.mrb[0].mxu1 }
 0x1d0   :  { %v218_v26 = vadd.f32 %v217_v25, %v145_v24  ;;  %v272_v27 = vpop.f32.mrb[1].mxu1 }
 0x1d2   :  { %v223_v29 = vrot.slane %v218_v26, 4 }
 0x1d4   :  { %v225_v30 = vmul.f32 %v223_v29, %v221_v28 }
 0x1d6   :  { %v226_v31 = vadd.f32 %v225_v30, %v218_v26 }
 0x1d8   :  { %227 = vst [vmem:[#allocation5] sm:$0xf] %v226_v31 }
 0x1d9   :  { %327 = shalt.err (!%p324_p12)
}
 0x1da   :  { %s328_s25 = scalar_lea.hbm %s438_s6, 64 }
 0x1db   :  { %p329_p13 = scmp.ne.s32.totalorder %s438_s6, %s328_s25  ;;  %p332_p0 = scmp.lt.u32.totalorder %s328_s25, %s438_s6 }
 0x1dd   :  { %p334_p1 = pnand %p332_p0, %p329_p13 }
 0x1df   :  { %337 = shalt.err (!%p334_p1)
}
 0x1e0   :  { %237 = dma.vmem_to_hbm [thread:$0]  %s235_s22, 64, %s438_s6, [#allocation4]  }
 0x1e1   :  { %340 = dma.done.wait [#allocation4], 64  }
 0x1e2   :  { %341 = vsyncadd [#allocation4], 4294967232 }
 0x1e3   :  { %241 = vsyncpa [#allocation3], 1 }
 0x1e4   :  { %242 = vsyncpa [#allocation4], 1 }

</bundles_post_ra>
